<compile_context>
chip_gen: v6e
topology: v6e:2x2x1
jax: 0.10.0
libtpu: 0.0.40
codegen_flags: <defaults>
</compile_context>

<pallas_src>
import jax
import jax.numpy as jnp
from jax.experimental import pallas as pl
from jax.experimental.pallas import tpu as pltpu


# ------------------------------ kernel 1: 1x1 conv ---------------------------
def _conv1x1_kernel(x_ref, w_ref, b_ref, o_ref):
    # x_ref : (bt, C_in, H*W)    bf16  free NCHW view of the feature map
    # w_ref : (C_out, C_in)      bf16  conv weight
    # b_ref : (C_out, 1)         f32   precomputed bias column (VMEM)
    # o_ref : (bt, C_out, H*W)   bf16
    w = w_ref[...]
    bias = b_ref[...]
    for b in range(x_ref.shape[0]):                   # static unroll over batch tile
        y = jnp.dot(w, x_ref[b], preferred_element_type=jnp.float32)
        o_ref[b] = (y + bias).astype(o_ref.dtype)


def conv1x1(x_view, w2d, bias_col, *, batch_tile=1):
    b, c_in, hw = x_view.shape
    c_out = w2d.shape[0]
    assert b % batch_tile == 0
    cost = pl.CostEstimate(
        flops=2 * b * c_out * c_in * hw,
        transcendentals=0,
        bytes_accessed=(x_view.size + w2d.size + b * c_out * hw) * 2
        + bias_col.size * 4,
    )
    return pl.pallas_call(
        _conv1x1_kernel,
        out_shape=jax.ShapeDtypeStruct((b, c_out, hw), jnp.bfloat16),
        grid=(b // batch_tile,),
        in_specs=[
            pl.BlockSpec((batch_tile, c_in, hw), lambda i: (i, 0, 0)),
            pl.BlockSpec((c_out, c_in), lambda i: (0, 0)),
            pl.BlockSpec((c_out, 1), lambda i: (0, 0)),
        ],
        out_specs=pl.BlockSpec((batch_tile, c_out, hw), lambda i: (i, 0, 0)),
        compiler_params=pltpu.CompilerParams(
            dimension_semantics=("parallel",),
            vmem_limit_bytes=32 * 1024 * 1024,
        ),
        cost_estimate=cost,
    )(x_view, w2d, bias_col)


# ---------------------- kernel 2: x4 bilinear upsample -----------------------
def _upsample4_kernel(y_ref, mxt_ref, my_ref, o_ref):
    # y_ref  : (bt, C_out*H, W)         bf16  free view of conv output
    # mxt_ref: (W, Wout)                bf16  Mx^T  (x-pass)
    # my_ref : (Hout, H)                bf16  My    (y-pass)
    # o_ref  : (bt, C_out, Hout, Wout)  f32
    c_out = o_ref.shape[1]
    h = y_ref.shape[1] // c_out
    mxt = mxt_ref[...]
    my = my_ref[...]
    for b in range(y_ref.shape[0]):                   # static unroll over batch tile
        # x-pass for all channels at once: (C_out*H, W) @ (W, Wout).
        t = jnp.dot(y_ref[b], mxt, preferred_element_type=jnp.float32)
        t = t.astype(jnp.bfloat16)
        # y-pass: block-diagonal kron(I_Cout, My) done as a per-channel loop.
        for c in range(c_out):
            o_ref[b, c] = jnp.dot(
                my, t[c * h:(c + 1) * h, :],
                preferred_element_type=jnp.float32,
            ).astype(o_ref.dtype)


def bilinear_upsample4(y_view, mxt, my, c_out, *, batch_tile=1):
    b, ch, w_in = y_view.shape
    h = ch // c_out
    hout, wout = my.shape[0], mxt.shape[1]
    assert b % batch_tile == 0
    cost = pl.CostEstimate(
        flops=2 * b * (ch * w_in * wout + c_out * hout * h * wout),
        transcendentals=0,
        bytes_accessed=(y_view.size + mxt.size + my.size) * 2
        + b * c_out * hout * wout * 4,
    )
    return pl.pallas_call(
        _upsample4_kernel,
        out_shape=jax.ShapeDtypeStruct((b, c_out, hout, wout), jnp.float32),
        grid=(b // batch_tile,),
        in_specs=[
            pl.BlockSpec((batch_tile, ch, w_in), lambda i: (i, 0, 0)),
            pl.BlockSpec((w_in, wout), lambda i: (0, 0)),
            pl.BlockSpec((hout, h), lambda i: (0, 0)),
        ],
        out_specs=pl.BlockSpec((batch_tile, c_out, hout, wout),
                               lambda i: (i, 0, 0, 0)),
        compiler_params=pltpu.CompilerParams(
            dimension_semantics=("parallel",),
            vmem_limit_bytes=32 * 1024 * 1024,
        ),
        cost_estimate=cost,
    )(y_view, mxt, my)


# ------------------------------ parameter setup ------------------------------
def bilinear_matrix(in_size, out_size):
    """Interpolation matrix M (out_size, in_size), align_corners=True, f32."""
    if out_size == 1:
        src = jnp.zeros((1,), jnp.float32)
    else:
        src = jnp.arange(out_size, dtype=jnp.float32) * (in_size - 1) / (out_size - 1)
    i0 = jnp.clip(jnp.floor(src).astype(jnp.int32), 0, in_size - 1)
    i1 = jnp.clip(i0 + 1, 0, in_size - 1)
    frac = src - i0.astype(jnp.float32)
    rows = jnp.arange(out_size)
    m = jnp.zeros((out_size, in_size), jnp.float32)
    m = m.at[rows, i0].add(1.0 - frac)
    m = m.at[rows, i1].add(frac)
    return m


def make_kdnet_params(conv_w, conv_b, h, w, scale=4):
    """Precompute (once, at model-setup time) everything the kernels need."""
    c_out, c_in = conv_w.shape[0], conv_w.shape[1]
    w2d = conv_w.reshape(c_out, c_in).astype(jnp.bfloat16)        # (C_out, C_in)
    my = bilinear_matrix(h, scale * h).astype(jnp.bfloat16)       # (Hout, H)
    mxt = bilinear_matrix(w, scale * w).astype(jnp.bfloat16).T    # (W, Wout)
    bias_col = conv_b.reshape(c_out, 1).astype(jnp.float32)       # (C_out, 1)
    return w2d, mxt, my, bias_col


# --------------------------------- forward -----------------------------------
def kdnet_forward(feat, w2d, mxt, my, bias_col,
                  *, conv_batch_tile=1, up_batch_tile=1):
    """feat: contiguous NCHW (B, 48, H, W) backbone feature map -> (seg_pre, loss)."""
    b, c_in, h, w = feat.shape
    c_out = w2d.shape[0]
    # Dropout(0.2) -> identity in eval mode.
    x = feat if feat.dtype == jnp.bfloat16 else feat.astype(jnp.bfloat16)
    x_view = x.reshape(b, c_in, h * w)              # free NCHW view (contiguous)
    y = conv1x1(x_view, w2d, bias_col, batch_tile=conv_batch_tile)
    y_view = y.reshape(b, c_out * h, w)             # free view of the same buffer
    seg_pre = bilinear_upsample4(y_view, mxt, my, c_out, batch_tile=up_batch_tile)
    loss = jnp.zeros((), feat.dtype)                # seg_gt / seg_kd not provided
    return seg_pre, loss


if __name__ == "__main__":
    key = jax.random.PRNGKey(0)
    kx, kw, kb = jax.random.split(key, 3)

    # Small demo shapes.  C_in=48 / C_out=2 are fixed by the module; W >= 32 so
    # that Wout = 4*W >= 128 and the output stores are lane-dense.
    B, C_IN, H, W = 2, 48, 16, 32
    C_OUT, SCALE = 2, 4

    feat = jax.random.normal(kx, (B, C_IN, H, W), jnp.float32).astype(jnp.bfloat16)
    conv_w = jax.random.normal(kw, (C_OUT, C_IN, 1, 1), jnp.float32) * 0.1
    conv_b = jax.random.normal(kb, (C_OUT,), jnp.float32) * 0.1

    w2d, mxt, my, bias_col = make_kdnet_params(conv_w, conv_b, H, W, SCALE)

    fwd = jax.jit(kdnet_forward,
                  static_argnames=("conv_batch_tile", "up_batch_tile"))
    # conv: whole (tiny) batch in one grid step; upsample: grid parallel over
    # batch so both v7x TensorCores get work.
    seg_pre, loss = fwd(feat, w2d, mxt, my, bias_col,
                        conv_batch_tile=B, up_batch_tile=1)
    seg_pre = jax.block_until_ready(seg_pre)
    loss = jax.block_until_ready(loss)

    # Pure-JAX f32 reference built from the same bf16-quantized inputs.
    feat_f = feat.astype(jnp.float32)
    w_f = w2d.astype(jnp.float32)
    ref_y = jnp.einsum("oc,bchw->bohw", w_f, feat_f) + conv_b[None, :, None, None]
    my_f = my.astype(jnp.float32)                    # (Hout, H)
    mx_f = mxt.astype(jnp.float32).T                 # (Wout, W)
    ref = jnp.einsum("ph,bchw,qw->bcpq", my_f, ref_y, mx_f)

    assert seg_pre.shape == (B, C_OUT, SCALE * H, SCALE * W)
    assert seg_pre.dtype == jnp.float32
    # bf16 inputs / bf16 intermediates -> ~1% relative error budget vs f32 ref.
    assert jnp.allclose(seg_pre, ref, atol=5e-2, rtol=5e-2)
    assert float(loss) == 0.0

    print("KERNEL_OK")
</pallas_src>

<mosaic_0001>
module attributes {stable_mosaic.version = 11 : i64} {
  func.func @_conv1x1_kernel(%arg0: i32, %arg1: memref<2x48x512xbf16, #tpu.memory_space<vmem>>, %arg2: memref<2x48xbf16, #tpu.memory_space<vmem>>, %arg3: memref<2x1xf32, #tpu.memory_space<vmem>>, %arg4: memref<2x2x512xbf16, #tpu.memory_space<vmem>>) attributes {dimension_semantics = [#tpu.dimension_semantics<parallel>], iteration_bounds = array<i64: 1>, scalar_prefetch = 0 : i64, scratch_operands = 0 : i64, tpu.core_type = #tpu.core_type<tc>, window_params = [{transform_indices = @transform_0, window_bounds = array<i64: 2, 48, 512>}, {pipeline_mode = #tpu.pipeline_mode<synchronous>, transform_indices = @transform_1, window_bounds = array<i64: 2, 48>}, {pipeline_mode = #tpu.pipeline_mode<synchronous>, transform_indices = @transform_2, window_bounds = array<i64: 2, 1>}, {transform_indices = @transform_3, window_bounds = array<i64: 2, 2, 512>}]} {
    %c0 = arith.constant 0 : index
    %c0_0 = arith.constant 0 : index
    %0 = vector.load %arg2[%c0, %c0_0] : memref<2x48xbf16, #tpu.memory_space<vmem>>, vector<2x48xbf16>
    %c0_1 = arith.constant 0 : index
    %c0_2 = arith.constant 0 : index
    %1 = vector.load %arg3[%c0_1, %c0_2] : memref<2x1xf32, #tpu.memory_space<vmem>>, vector<2x1xf32>
    %c0_3 = arith.constant 0 : index
    %c0_4 = arith.constant 0 : index
    %c0_5 = arith.constant 0 : index
    %2 = vector.load %arg1[%c0_3, %c0_4, %c0_5] : memref<2x48x512xbf16, #tpu.memory_space<vmem>>, vector<1x48x512xbf16>
    %3 = vector.shape_cast %2 : vector<1x48x512xbf16> to vector<48x512xbf16>
    %cst = arith.constant dense<0.000000e+00> : vector<2x512xf32>
    %4 = tpu.matmul %0, %3, %cst {dimension_numbers = #tpu.dot_dimension_numbers<[1], [0], [0], [1], [0, 0, 1, 1], [], []>} : vector<2x48xbf16>, vector<48x512xbf16>, vector<2x512xf32> -> vector<2x512xf32>
    %5 = vector.broadcast %1 : vector<2x1xf32> to vector<2x512xf32>
    %6 = arith.addf %4, %5 : vector<2x512xf32>
    %7 = arith.truncf %6 : vector<2x512xf32> to vector<2x512xbf16>
    %c0_6 = arith.constant 0 : index
    %c0_7 = arith.constant 0 : index
    %c0_8 = arith.constant 0 : index
    %8 = vector.load %arg4[%c0_6, %c0_7, %c0_8] : memref<2x2x512xbf16, #tpu.memory_space<vmem>>, vector<1x2x512xbf16>
    %9 = vector.shape_cast %8 : vector<1x2x512xbf16> to vector<2x512xbf16>
    %10 = vector.shape_cast %7 : vector<2x512xbf16> to vector<1x2x512xbf16>
    tpu.vector_store %arg4[%c0_6, %c0_7, %c0_8], %10 {strides = array<i32>} : memref<2x2x512xbf16, #tpu.memory_space<vmem>>, vector<1x2x512xbf16>,
    %c1 = arith.constant 1 : index
    %c0_9 = arith.constant 0 : index
    %c0_10 = arith.constant 0 : index
    %11 = vector.load %arg1[%c1, %c0_9, %c0_10] : memref<2x48x512xbf16, #tpu.memory_space<vmem>>, vector<1x48x512xbf16>
    %12 = vector.shape_cast %11 : vector<1x48x512xbf16> to vector<48x512xbf16>
    %cst_11 = arith.constant dense<0.000000e+00> : vector<2x512xf32>
    %13 = tpu.matmul %0, %12, %cst_11 {dimension_numbers = #tpu.dot_dimension_numbers<[1], [0], [0], [1], [0, 0, 1, 1], [], []>} : vector<2x48xbf16>, vector<48x512xbf16>, vector<2x512xf32> -> vector<2x512xf32>
    %14 = vector.broadcast %1 : vector<2x1xf32> to vector<2x512xf32>
    %15 = arith.addf %13, %14 : vector<2x512xf32>
    %16 = arith.truncf %15 : vector<2x512xf32> to vector<2x512xbf16>
    %c1_12 = arith.constant 1 : index
    %c0_13 = arith.constant 0 : index
    %c0_14 = arith.constant 0 : index
    %17 = vector.load %arg4[%c1_12, %c0_13, %c0_14] : memref<2x2x512xbf16, #tpu.memory_space<vmem>>, vector<1x2x512xbf16>
    %18 = vector.shape_cast %17 : vector<1x2x512xbf16> to vector<2x512xbf16>
    %19 = vector.shape_cast %16 : vector<2x512xbf16> to vector<1x2x512xbf16>
    tpu.vector_store %arg4[%c1_12, %c0_13, %c0_14], %19 {strides = array<i32>} : memref<2x2x512xbf16, #tpu.memory_space<vmem>>, vector<1x2x512xbf16>,
    return
  }
  func.func @transform_0(%arg0: i32) -> (i32, i32, i32) {
    %c0_i32 = arith.constant 0 : i32
    %c0_i32_0 = arith.constant 0 : i32
    %c0_i32_1 = arith.constant 0 : i32
    return %arg0, %c0_i32, %c0_i32_0 : i32, i32, i32
  }
  func.func @transform_1(%arg0: i32) -> (i32, i32) {
    %c0_i32 = arith.constant 0 : i32
    %c0_i32_0 = arith.constant 0 : i32
    %c0_i32_1 = arith.constant 0 : i32
    return %c0_i32, %c0_i32_0 : i32, i32
  }
  func.func @transform_2(%arg0: i32) -> (i32, i32) {
    %c0_i32 = arith.constant 0 : i32
    %c0_i32_0 = arith.constant 0 : i32
    %c0_i32_1 = arith.constant 0 : i32
    return %c0_i32, %c0_i32_0 : i32, i32
  }
  func.func @transform_3(%arg0: i32) -> (i32, i32, i32) {
    %c0_i32 = arith.constant 0 : i32
    %c0_i32_0 = arith.constant 0 : i32
    %c0_i32_1 = arith.constant 0 : i32
    return %arg0, %c0_i32, %c0_i32_0 : i32, i32, i32
  }
}

module attributes {stable_mosaic.version = 11 : i64} {
  func.func @_upsample4_kernel(%arg0: i32, %arg1: memref<1x32x32xbf16, #tpu.memory_space<vmem>>, %arg2: memref<32x128xbf16, #tpu.memory_space<vmem>>, %arg3: memref<64x16xbf16, #tpu.memory_space<vmem>>, %arg4: memref<1x2x64x128xf32, #tpu.memory_space<vmem>>) attributes {dimension_semantics = [#tpu.dimension_semantics<parallel>], iteration_bounds = array<i64: 2>, scalar_prefetch = 0 : i64, scratch_operands = 0 : i64, tpu.core_type = #tpu.core_type<tc>, window_params = [{transform_indices = @transform_0, window_bounds = array<i64: 1, 32, 32>}, {pipeline_mode = #tpu.pipeline_mode<synchronous>, transform_indices = @transform_1, window_bounds = array<i64: 32, 128>}, {pipeline_mode = #tpu.pipeline_mode<synchronous>, transform_indices = @transform_2, window_bounds = array<i64: 64, 16>}, {transform_indices = @transform_3, window_bounds = array<i64: 1, 2, 64, 128>}]} {
    %c0 = arith.constant 0 : index
    %c0_0 = arith.constant 0 : index
    %0 = vector.load %arg2[%c0, %c0_0] : memref<32x128xbf16, #tpu.memory_space<vmem>>, vector<32x128xbf16>
    %c0_1 = arith.constant 0 : index
    %c0_2 = arith.constant 0 : index
    %1 = vector.load %arg3[%c0_1, %c0_2] : memref<64x16xbf16, #tpu.memory_space<vmem>>, vector<64x16xbf16>
    %c0_3 = arith.constant 0 : index
    %c0_4 = arith.constant 0 : index
    %c0_5 = arith.constant 0 : index
    %2 = vector.load %arg1[%c0_3, %c0_4, %c0_5] : memref<1x32x32xbf16, #tpu.memory_space<vmem>>, vector<1x32x32xbf16>
    %3 = vector.shape_cast %2 : vector<1x32x32xbf16> to vector<32x32xbf16>
    %cst = arith.constant dense<0.000000e+00> : vector<32x128xf32>
    %4 = tpu.matmul %3, %0, %cst {dimension_numbers = #tpu.dot_dimension_numbers<[1], [0], [0], [1], [0, 0, 1, 1], [], []>} : vector<32x32xbf16>, vector<32x128xbf16>, vector<32x128xf32> -> vector<32x128xf32>
    %5 = arith.truncf %4 : vector<32x128xf32> to vector<32x128xbf16>
    %6 = vector.extract_strided_slice %5 {offsets = [0, 0], sizes = [16, 128], strides = [1, 1]} : vector<32x128xbf16> to vector<16x128xbf16>
    %cst_6 = arith.constant dense<0.000000e+00> : vector<64x128xf32>
    %7 = tpu.matmul %1, %6, %cst_6 {dimension_numbers = #tpu.dot_dimension_numbers<[1], [0], [0], [1], [0, 0, 1, 1], [], []>} : vector<64x16xbf16>, vector<16x128xbf16>, vector<64x128xf32> -> vector<64x128xf32>
    %c0_7 = arith.constant 0 : index
    %c0_8 = arith.constant 0 : index
    %c0_9 = arith.constant 0 : index
    %c0_10 = arith.constant 0 : index
    %8 = vector.load %arg4[%c0_7, %c0_8, %c0_9, %c0_10] : memref<1x2x64x128xf32, #tpu.memory_space<vmem>>, vector<1x1x64x128xf32>
    %9 = vector.shape_cast %8 : vector<1x1x64x128xf32> to vector<64x128xf32>
    %10 = vector.shape_cast %7 : vector<64x128xf32> to vector<1x1x64x128xf32>
    tpu.vector_store %arg4[%c0_7, %c0_8, %c0_9, %c0_10], %10 {strides = array<i32>} : memref<1x2x64x128xf32, #tpu.memory_space<vmem>>, vector<1x1x64x128xf32>,
    %11 = vector.extract_strided_slice %5 {offsets = [16, 0], sizes = [16, 128], strides = [1, 1]} : vector<32x128xbf16> to vector<16x128xbf16>
    %cst_11 = arith.constant dense<0.000000e+00> : vector<64x128xf32>
    %12 = tpu.matmul %1, %11, %cst_11 {dimension_numbers = #tpu.dot_dimension_numbers<[1], [0], [0], [1], [0, 0, 1, 1], [], []>} : vector<64x16xbf16>, vector<16x128xbf16>, vector<64x128xf32> -> vector<64x128xf32>
    %c0_12 = arith.constant 0 : index
    %c1 = arith.constant 1 : index
    %c0_13 = arith.constant 0 : index
    %c0_14 = arith.constant 0 : index
    %13 = vector.load %arg4[%c0_12, %c1, %c0_13, %c0_14] : memref<1x2x64x128xf32, #tpu.memory_space<vmem>>, vector<1x1x64x128xf32>
    %14 = vector.shape_cast %13 : vector<1x1x64x128xf32> to vector<64x128xf32>
    %15 = vector.shape_cast %12 : vector<64x128xf32> to vector<1x1x64x128xf32>
    tpu.vector_store %arg4[%c0_12, %c1, %c0_13, %c0_14], %15 {strides = array<i32>} : memref<1x2x64x128xf32, #tpu.memory_space<vmem>>, vector<1x1x64x128xf32>,
    return
  }
  func.func @transform_0(%arg0: i32) -> (i32, i32, i32) {
    %c0_i32 = arith.constant 0 : i32
    %c0_i32_0 = arith.constant 0 : i32
    %c0_i32_1 = arith.constant 0 : i32
    return %arg0, %c0_i32, %c0_i32_0 : i32, i32, i32
  }
  func.func @transform_1(%arg0: i32) -> (i32, i32) {
    %c0_i32 = arith.constant 0 : i32
    %c0_i32_0 = arith.constant 0 : i32
    %c0_i32_1 = arith.constant 0 : i32
    return %c0_i32, %c0_i32_0 : i32, i32
  }
  func.func @transform_2(%arg0: i32) -> (i32, i32) {
    %c0_i32 = arith.constant 0 : i32
    %c0_i32_0 = arith.constant 0 : i32
    %c0_i32_1 = arith.constant 0 : i32
    return %c0_i32, %c0_i32_0 : i32, i32
  }
  func.func @transform_3(%arg0: i32) -> (i32, i32, i32, i32) {
    %c0_i32 = arith.constant 0 : i32
    %c0_i32_0 = arith.constant 0 : i32
    %c0_i32_1 = arith.constant 0 : i32
    %c0_i32_2 = arith.constant 0 : i32
    return %arg0, %c0_i32, %c0_i32_0, %c0_i32_1 : i32, i32, i32, i32
  }
}

</mosaic_0001>

<bundles_post_ra>
// kernel: kdnet_forward.2
= control target key start
LH: loop header
LB: loop body
LE: loop exit
PB: predicated region body
PF: predicated region fallthrough
CT: control target
= control target key end

     0   :  { %v494_v1 = vmov 0   ;;  %vm94_vm0 = vcmask 392192   ;;  %v495_v27 = vmov 1966171168   ;;  %v193_v29 = vlaneseq  ;;  %s604_s0 = inlined_call_operand.vmem [shape: bf16[2,48,512], index: 0, kind: input, shape index: {}]   ;;  %s605_s1 = inlined_call_operand.vmem [shape: bf16[2,48], index: 1, kind: input, shape index: {}]   ;;  %s606_s2 = inlined_call_operand.vmem [shape: f32[2,1], index: 2, kind: input, shape index: {}]   ;;  %s607_s3 = inlined_call_operand.vmem [shape: bf16[2,2,512], index: 3, kind: output, shape index: {}]  }
   0x1   :  { %v458_v0 = vld [vmem:[%s604_s0 + $0x44] ss:$16 sps:$4 sm:$0xff]   ;;  %130 = vmatprep.mubr.bf16.mxu0 %v494_v1  ;;  %171 = vmatprep.mubr.bf16.mxu1 %v494_v1  ;;  %v460_v2 = vld [vmem:[%s604_s0 + $0x4c] ss:$16 sps:$4 sm:$0xff]   ;;  %v462_v3 = vld [vmem:[%s604_s0 + $0x40] ss:$16 sps:$4 sm:$0xff]   ;;  %v191_v28 = vunpack.c.l.s4 %v495_v27 }
   0x2   :  { %457 = vset.pattern.permute.xlu0 %v494_v1  ;;  %108 = vmatprep.subr.bf16.mxu0 %v458_v0  ;;  %v463_v4 = vld [vmem:[%s604_s0 + $0x48] ss:$16 sps:$4 sm:$0xff]   ;;  %v464_v5 = vld [vmem:[%s604_s0 + $0x24] ss:$16 sps:$4 sm:$0xff]   ;;  %v466_v6 = vld [vmem:[%s604_s0 + $0x2c] ss:$16 sps:$4 sm:$0xff]  }
   0x3   :  { %149 = vmatprep.subr.bf16.mxu1 %v460_v2  ;;  %109 = vmatpush1.bf16.msra.mxu0 %v462_v3  ;;  %v468_v7 = vld [vmem:[%s604_s0 + $0x20] ss:$16 sps:$4 sm:$0xff]   ;;  %v469_v8 = vld [vmem:[%s604_s0 + $0x28] ss:$16 sps:$4 sm:$0xff]   ;;  %v470_v9 = vld [vmem:[%s604_s0 + $0x4] ss:$16 sps:$4 sm:$0xff]   ;;  %v192_v31 = vunpack.c.0.s8 %v191_v28 }
   0x4   :  { %150 = vmatpush1.bf16.msra.mxu1 %v463_v4  ;;  %110 = vmatprep.subr.bf16.mxu0 %v464_v5  ;;  %v472_v10 = vld [vmem:[%s604_s0 + $0xc] ss:$16 sps:$4 sm:$0xff]   ;;  %v474_v11 = vld [vmem:[%s604_s0] ss:$16 sps:$4 sm:$0xff]   ;;  %v475_v12 = vld [vmem:[%s604_s0 + $0x8] ss:$16 sps:$4 sm:$0xff]  }
   0x5   :  { %151 = vmatprep.subr.bf16.mxu1 %v466_v6  ;;  %v478_v13 = vld [vmem:[%s604_s0 + $0xa4] ss:$16 sps:$4 sm:$0xff]   ;;  %v15_v14 = vld [vmem:[%s605_s1] sm:$0x1]  ;;  %v481_v15 = vld [vmem:[%s604_s0 + $0xac] ss:$16 sps:$4 sm:$0xff]  }
   0x6   :  { %v476_v16 = vld [vmem:[%s604_s0 + $0xa0] ss:$16 sps:$4 sm:$0xff]   ;;  %v479_v17 = vld [vmem:[%s604_s0 + $0xa8] ss:$16 sps:$4 sm:$0xff]   ;;  %v484_v18 = vld [vmem:[%s604_s0 + $0x84] ss:$16 sps:$4 sm:$0xff]  }
   0x7   :  { %111 = vmatpush1.bf16.msra.mxu0 %v468_v7  ;;  %v487_v19 = vld [vmem:[%s604_s0 + $0x8c] ss:$16 sps:$4 sm:$0xff]   ;;  %v482_v20 = vld [vmem:[%s604_s0 + $0x80] ss:$16 sps:$4 sm:$0xff]   ;;  %v485_v21 = vld [vmem:[%s604_s0 + $0x88] ss:$16 sps:$4 sm:$0xff]  }
   0x8   :  { %152 = vmatpush1.bf16.msra.mxu1 %v469_v8  ;;  %112 = vmatprep.subr.bf16.mxu0 %v470_v9  ;;  %v16_v22 = vld [vmem:[%s606_s2] sm:$0x3]  ;;  %v490_v23 = vld [vmem:[%s604_s0 + $0x64] ss:$16 sps:$4 sm:$0xff]   ;;  %v493_v24 = vld [vmem:[%s604_s0 + $0x6c] ss:$16 sps:$4 sm:$0xff]  }
   0x9   :  { %153 = vmatprep.subr.bf16.mxu1 %v472_v10  ;;  %31 = vperm.xlu0 %457, %v16_v22   ;;  %v488_v25 = vld [vmem:[%s604_s0 + $0x60] ss:$16 sps:$4 sm:$0xff]   ;;  %v491_v26 = vld [vmem:[%s604_s0 + $0x68] ss:$16 sps:$4 sm:$0xff]   ;;  %v194_v32 = vshrl.u32 %v193_v29, 7 }
   0xb   :  { %113 = vmatpush1.bf16.msra.mxu0 %v474_v11  ;;  %v195_v40 = vsub.s32 %v192_v31, %v194_v32 }
   0xc   :  { %154 = vmatpush1.bf16.msra.mxu1 %v475_v12  ;;  %297 = vmatprep.subr.bf16.mxu0 %v478_v13 }
   0xd   :  { %338 = vmatprep.subr.bf16.mxu1 %v481_v15 }
   0xe   :  { %420 = vmatmul.mubr.msk.bf16.vlgmr.msra.gmra.mxu0 %vm94_vm0, %v15_v14 }
   0xf   :  { %421 = vmatmul.mubr.msk.bf16.vlgmr.msra.gmra.mxu1 %vm94_vm0, %v15_v14  ;;  %298 = vmatpush1.bf16.msra.mxu0 %v476_v16 }
  0x10   :  { %339 = vmatpush1.bf16.msra.mxu1 %v479_v17  ;;  %299 = vmatprep.subr.bf16.mxu0 %v484_v18 }
  0x11   :  { %340 = vmatprep.subr.bf16.mxu1 %v487_v19  ;;  %319 = vmatprep.mubr.bf16.mxu0 %v494_v1 }
  0x12   :  { %360 = vmatprep.mubr.bf16.mxu1 %v494_v1 }
  0x13   :  { %300 = vmatpush1.bf16.msra.mxu0 %v482_v20 }
  0x14   :  { %341 = vmatpush1.bf16.msra.mxu1 %v485_v21  ;;  %301 = vmatprep.subr.bf16.mxu0 %v490_v23 }
  0x15   :  { %342 = vmatprep.subr.bf16.mxu1 %v493_v24 }
  0x17   :  { %302 = vmatpush1.bf16.msra.mxu0 %v488_v25 }
  0x18   :  { %343 = vmatpush1.bf16.msra.mxu1 %v491_v26 }
  0x1a   :  { %449 = vmatmul.mubr.msk.bf16.vlgmr.msra.gmra.mxu0 %vm94_vm0, %v15_v14 }
  0x1b   :  { %450 = vmatmul.mubr.msk.bf16.vlgmr.msra.gmra.mxu1 %vm94_vm0, %v15_v14 }
  0x84   :  { %v32_v30 = vpop.permute.xlu0 %31 }
  0xce   :  { %v132_v33 = vpop.f32.mrf.mxu0 }
  0xcf   :  { %v173_v34 = vpop.f32.mrf.mxu1  ;;  %v133_v35 = vadd.f32 %v132_v33, %v32_v30 }
  0xd0   :  { %v174_v36 = vadd.f32 %v173_v34, %v32_v30  ;;  %v134_v37 = vpop.f32.mrf.mxu0 }
  0xd1   :  { %v175_v38 = vpop.f32.mrf.mxu1  ;;  %v135_v39 = vadd.f32 %v134_v37, %v32_v30 }
  0xd2   :  { %v176_v41 = vadd.f32 %v175_v38, %v32_v30  ;;  %v136_v42 = vpop.f32.mrf.mxu0 }
  0xd3   :  { %v177_v43 = vpop.f32.mrf.mxu1  ;;  %v422_v44 = vpack.c.bf16 %v135_v39, %v133_v35 }
  0xd4   :  { %v423_v45 = vpack.c.bf16 %v176_v41, %v174_v36  ;;  %v137_v46 = vpop.f32.mrf.mxu0 }
  0xd5   :  { %v178_v47 = vpop.f32.mrf.mxu1  ;;  %v196_v48 = vrot.slane %v422_v44, %v195_v40 }
  0xd6   :  { %v203_v49 = vrot.slane %v423_v45, %v195_v40 }
  0xd8   :  { %v204_v50 = vcombine.low %v196_v48, %v203_v49 }
  0xda   :  { %424 = vst.sshfl [vmem:[%s607_s3] sm:$0x55 pattern:$0x73625140] %v204_v50  ;;  %v321_v51 = vpop.f32.mrf.mxu0 }
  0xdb   :  { %v362_v52 = vpop.f32.mrf.mxu1  ;;  %v322_v55 = vadd.f32 %v321_v51, %v32_v30 }
  0xdc   :  { %v323_v53 = vpop.f32.mrf.mxu0  ;;  %v363_v56 = vadd.f32 %v362_v52, %v32_v30 }
  0xdd   :  { %v364_v54 = vpop.f32.mrf.mxu1  ;;  %v324_v57 = vadd.f32 %v323_v53, %v32_v30 }
  0xde   :  { %v365_v58 = vadd.f32 %v364_v54, %v32_v30  ;;  %v325_v59 = vpop.f32.mrf.mxu0 }
  0xdf   :  { %v366_v60 = vpop.f32.mrf.mxu1  ;;  %v451_v61 = vpack.c.bf16 %v324_v57, %v322_v55 }
  0xe0   :  { %v452_v62 = vpack.c.bf16 %v365_v58, %v363_v56  ;;  %v326_v63 = vpop.f32.mrf.mxu0 }
  0xe1   :  { %v367_v0 = vpop.f32.mrf.mxu1  ;;  %v385_v1 = vrot.slane %v451_v61, %v195_v40 }
  0xe2   :  { %v392_v2 = vrot.slane %v452_v62, %v195_v40 }
  0xe4   :  { %v393_v3 = vcombine.low %v385_v1, %v392_v2 }
  0xe6   :  { %454 = vst.sshfl [vmem:[%s607_s3 + $0x4] sm:$0x55 pattern:$0x73625140] %v393_v3 }

// kernel: kdnet_forward.3
= control target key start
LH: loop header
LB: loop body
LE: loop exit
PB: predicated region body
PF: predicated region fallthrough
CT: control target
= control target key end

     0   :  { %8 = vsyncpa [#allocation3], 0  ;;  %s891_s0 = inlined_call_operand.vmem [shape: bf16[2,32,32], index: 0, kind: input, shape index: {}]   ;;  %s892_s1 = inlined_call_operand.vmem [shape: bf16[32,128], index: 1, kind: input, shape index: {}]   ;;  %s893_s2 = inlined_call_operand.vmem [shape: bf16[64,16], index: 2, kind: input, shape index: {}]   ;;  %s894_s3 = inlined_call_operand.hbm [shape: f32[2,2,64,128], index: 3, kind: output, shape index: {}]  }
   0x1   :  { %10 = vsyncpa [#allocation3 + $0x1], 0  ;;  %s740_s12 = smov 0   ;;  %s742_s13 = smov 0  }
   0x2   :  { %s744_s14 = smov 0   ;;  %s746_s15 = smov 0  }
   0x3 LB: > { %s761_s16 = sadd.s32 4294967295, %s715_s15   ;;  %s522_s17 = sadd.s32 4294967294, %s715_s15   ;;  %s715_s15 = sphi %s746_s15, %s900_s15   ;;  %s711_s14 = sphi %s744_s14, %s899_s14   ;;  %s707_s13 = sphi %s742_s13, %s898_s13   ;;  %s703_s12 = sphi %s740_s12, %s897_s12  }
   0x4   : > { %s765_s18 = sadd.s32 1, %s715_s15   ;;  %s91_s19 = sadd.s32 1, %s711_s14 }
   0x5   : > { %s88_s20 = ssub.s32 %s715_s15, %s765_s18  ;;  %p101_p0 = scmp.ne.s32.totalorder %s711_s14, %s707_s13 }
   0x6   : > { %p89_p1 = scmp.eq.s32.totalorder %s88_s20, 0  ;;  %p102_p2 = scmp.eq.s32.totalorder %s761_s16, 1 }
   0x7   : > { %p107_p3 = scmp.ne.s32.totalorder %s707_s13, %s703_s12  ;;  %p108_p4 = scmp.eq.s32.totalorder %s522_s17, 1 }
   0x8   : > { %s776_s21 = scalar_select %p89_p1, %s711_s14, %s91_s19  }
   0x9   : > { %p778_p5 = por %p102_p2, %p101_p0  ;;  %p782_p6 = por %p108_p4, %p107_p3 }
   0xa   : > { %p525_p7 = scmp.ge.s32.totalorder %s715_s15, 1  ;;  %p140_p8 = scmp.lt.s32.totalorder %s715_s15, 3 }
   0xc   : > { %p141_p9 = pnand %p525_p7, %p140_p8 }
   0xd   : > { %p164_p10 = scmp.lt.s32.totalorder (!%p141_p9), %s761_s16, 1  ;;  %s161_s20 = sand.u32 (!%p141_p9), 1, %s707_s13  }
   0xe   : > { %144 = sbr.rel (%p141_p9) target bundleno = 462 (0x1ce), region = 32  ;;  %s526_s24 = sshll.u32 (!%p141_p9), %s161_s20, 7 }
   0xf   : > { %s822_s25 = scalar_lea.vmem (!%p141_p9), [#allocation2], %s526_s24  ;;  %s561_s26 = sshll.u32 (!%p141_p9), %s761_s16, 11 }
  0x10   : > { %s460_s27 = sshll.u32 (!%p141_p9), %s822_s25, 4  ;;  %s843_s30 = scalar_lea.hbm (!%p141_p9), %s894_s3, %s561_s26  ;;  %s845_s27 = int_to_ptr.vmem [resolvable:$true] %s460_s27 }
  0x11   : > { %s851_s4 = scalar_lea.sflag (!%p141_p9), [#allocation3], %s161_s20 }
  0x13   : > { %v647_v0 = vld [vmem:[%s892_s1 + $0x8] sm:$0xff]   ;;  %v648_v1 = vld [vmem:[%s892_s1] sm:$0xff]   ;;  %s165_s28 = scalar_select %p164_p10, %s761_s16, 1  ;;  %vm208_vm0 = vcmask 261120   ;;  %vm286_vm1 = vcmask 130048   ;;  %v653_v12 = vld [vmem:[%s893_s2 + $0x10] sm:$0xff]  }
  0x14   : > { %576 = vmatprep.subr.bf16.mxu0 %v647_v0  ;;  %v651_v4 = vld [vmem:[%s893_s2] sm:$0xff]   ;;  %v652_v11 = vld [vmem:[%s893_s2 + $0x8] sm:$0xff]   ;;  %v654_v13 = vld [vmem:[%s893_s2 + $0x18] sm:$0xff]   ;;  %s655_s16 = scalar_lea.vmem %s845_s27, 2048 }
  0x15   : > { %577 = vmatpush3.bf16.msra.mxu0 %v647_v0  ;;  %s560_s29 = sshll.u32 %s165_s28, 4  ;;  %586 = vmatprep.mubr.msk.bf16.mxu1 %vm286_vm1, %v651_v4  ;;  %p656_p11 = scmp.ne.s32.totalorder %s845_s27, %s655_s16 }
  0x16   : > { %578 = vmatprep.subr.bf16.mxu0 %v648_v1  ;;  %s168_s5 = scalar_lea.vmem %s891_s0, %s560_s29 }
  0x17   : > { %v649_v2 = vld [vmem:[%s168_s5] sm:$0xff]   ;;  %v650_v3 = vld [vmem:[%s168_s5 + $0x8] sm:$0xff]   ;;  %p657_p12 = pnand %p656_p11, %p778_p5  ;;  %s717_s5 = smov [#allocation2]  }
  0x18   : > { %580 = vmatprep.mubr.msk.bf16.mxu0 %vm208_vm0, %v649_v2  ;;  %s659_s6 = sshll.u32 %s717_s5, 4  ;;  %s660_s6 = int_to_ptr.vmem [resolvable:$false] %s659_s6 }
  0x19   : > { %579 = vmatpush3.bf16.msra.mxu0 %v648_v1  ;;  %p658_p13 = pneg %p657_p12  ;;  %s661_s7 = scalar_lea.vmem %s660_s6, 4096 }
  0x1a   : > { %p662_p0 = scmp.lt.s32.totalorder %s845_s27, %s660_s6  ;;  %p663_p1 = scmp.lt.s32.totalorder %s661_s7, %s655_s16 }
  0x1c   : > { %581 = vmatmul.mubr.msk.bf16.vlgmr.msra.gmra.mxu0 %vm208_vm0, %v650_v3  ;;  %p664_p2 = por %p663_p1, %p662_p0 }
  0x1d   : > { %596 = vmatprep.mubr.msk.bf16.mxu0 %vm286_vm1, %v651_v4 }
  0x1e   : > { %p665_p3 = pnand %p664_p2, %p658_p13 }
  0xdc   : > { %v582_v5 = vpop.f32.mrf.mxu0 }
  0xde   : > { %v249_v6 = vpop.f32.mrf.mxu0 }
  0xe0   : > { %v583_v7 = vpop.f32.mrf.mxu0 }
  0xe1   : > { %v265_v8 = vpack.c.bf16 %v583_v7, %v582_v5 }
  0xe2   : > { %v252_v9 = vpop.f32.mrf.mxu0 }
  0xe3   : > { %v264_v10 = vpack.c.bf16 %v252_v9, %v249_v6  ;;  %594 = vmatprep.subr.bf16.mxu0 %v265_v8 }
  0xe4   : > { %595 = vmatpush3.bf16.msra.mxu0 %v265_v8 }
  0xe5   : > { %584 = vmatprep.subr.bf16.mxu1 %v264_v10 }
  0xe6   : > { %585 = vmatpush3.bf16.msra.mxu1 %v264_v10 }
  0xe7   : > { %604 = vmatprep.subr.bf16.mxu1 %v265_v8  ;;  %597 = vmatmul.mubr.msk.bf16.vlgmr.msra.gmra.mxu0 %vm286_vm1, %v652_v11 }
  0xe9   : > { %587 = vmatmul.mubr.msk.bf16.vlgmr.msra.gmra.mxu1 %vm286_vm1, %v652_v11 }
  0xea   : > { %605 = vmatpush3.bf16.msra.mxu1 %v265_v8  ;;  %590 = vmatprep.mubr.msk.bf16.mxu1 %vm286_vm1, %v653_v12 }
  0xf1   : > { %591 = vmatmul.mubr.msk.bf16.gmra.mxu1 %vm286_vm1, %v654_v13 }
  0xf2   : > { %600 = vmatprep.mubr.msk.bf16.mxu1 %vm286_vm1, %v653_v12 }
  0xf9   : > { %601 = vmatmul.mubr.msk.bf16.vlgmr.msra.gmra.mxu1 %vm286_vm1, %v654_v13 }
 0x1a7   : > { %v598_v14 = vpop.f32.mrf.mxu0 }
 0x1a8   : > { %549 = vst [vmem:[%s822_s25 + $0x50] sm:$0xff] %v598_v14 }
 0x1a9   : > { %v588_v15 = vpop.f32.mrf.mxu1  ;;  %v406_v16 = vpop.f32.mrf.mxu0 }
 0x1aa   : > { %366 = vst [vmem:[%s822_s25 + $0x10] sm:$0xff] %v588_v15  ;;  %547 = vst [vmem:[%s822_s25 + $0x40] sm:$0xff] %v406_v16 }
 0x1ab   : > { %v333_v17 = vpop.f32.mrf.mxu1  ;;  %v599_v18 = vpop.f32.mrf.mxu0 }
 0x1ac   : > { %364 = vst [vmem:[%s822_s25] sm:$0xff] %v333_v17  ;;  %550 = vst [vmem:[%s822_s25 + $0x58] sm:$0xff] %v599_v18 }
 0x1ad   : > { %v589_v19 = vpop.f32.mrf.mxu1  ;;  %v409_v20 = vpop.f32.mrf.mxu0 }
 0x1ae   : > { %367 = vst [vmem:[%s822_s25 + $0x18] sm:$0xff] %v589_v19  ;;  %548 = vst [vmem:[%s822_s25 + $0x48] sm:$0xff] %v409_v20 }
 0x1af   : > { %v336_v21 = vpop.f32.mrf.mxu1 }
 0x1b0   : > { %365 = vst [vmem:[%s822_s25 + $0x8] sm:$0xff] %v336_v21 }
 0x1b1   : > { %v592_v22 = vpop.f32.mrf.mxu1 }
 0x1b2   : > { %370 = vst [vmem:[%s822_s25 + $0x30] sm:$0xff] %v592_v22 }
 0x1b3   : > { %v349_v23 = vpop.f32.mrf.mxu1 }
 0x1b4   : > { %368 = vst [vmem:[%s822_s25 + $0x20] sm:$0xff] %v349_v23 }
 0x1b5   : > { %v593_v24 = vpop.f32.mrf.mxu1 }
 0x1b6   : > { %371 = vst [vmem:[%s822_s25 + $0x38] sm:$0xff] %v593_v24 }
 0x1b7   : > { %v352_v25 = vpop.f32.mrf.mxu1 }
 0x1b8   : > { %369 = vst [vmem:[%s822_s25 + $0x28] sm:$0xff] %v352_v25 }
 0x1b9   : > { %v602_v26 = vpop.f32.mrf.mxu1 }
 0x1ba   : > { %553 = vst [vmem:[%s822_s25 + $0x70] sm:$0xff] %v602_v26 }
 0x1bb   : > { %v422_v27 = vpop.f32.mrf.mxu1 }
 0x1bc   : > { %551 = vst [vmem:[%s822_s25 + $0x60] sm:$0xff] %v422_v27 }
 0x1bd   : > { %v603_v28 = vpop.f32.mrf.mxu1 }
 0x1be   : > { %554 = vst [vmem:[%s822_s25 + $0x78] sm:$0xff] %v603_v28 }
 0x1bf   : > { %v425_v29 = vpop.f32.mrf.mxu1 }
 0x1c0   : > { %552 = vst [vmem:[%s822_s25 + $0x68] sm:$0xff] %v425_v29 }
 0x1c1   : > { %668 = shalt.err (!%p665_p3)
}
 0x1c2   : > { %s669_s8 = scalar_lea.hbm %s843_s30, 2048  ;;  %s673_s11 = scalar_lea.hbm %s894_s3, 4096 }
 0x1c3   : > { %p670_p4 = scmp.ne.s32.totalorder %s843_s30, %s669_s8  ;;  %p674_p9 = scmp.lt.s32.totalorder %s843_s30, %s894_s3 }
 0x1c4   : > { %p675_p10 = scmp.lt.s32.totalorder %s673_s11, %s669_s8 }
 0x1c5   : > { %p671_p7 = pnand %p670_p4, %p778_p5 }
 0x1c6   : > { %p676_p11 = por %p675_p10, %p674_p9 }
 0x1c7   : > { %p672_p8 = pneg %p671_p7 }
 0x1c9   : > { %p677_p12 = pnand %p676_p11, %p672_p8 }
 0x1cb   : > { %680 = shalt.err (!%p677_p12)
}
 0x1cc   : > { %s718_s20 = smov 128   ;;  %s719_s24 = smov 8  }
 0x1cd   : > { %606 = dma.vmem_to_hbm [thread:$0]  (%p778_p5), %s845_s27, 2048, %s843_s30, %s851_s4, %s718_s20, %s718_s20, %s719_s24  }
 0x1ce PF: > { %p612_p13 = scmp.ge.s32.totalorder %s715_s15, 2  ;;  %s475_s25 = sand.u32 1, %s703_s12  }
 0x1cf   : > { %s476_s26 = scalar_lea.sflag [#allocation3], %s475_s25 }
 0x1d0   : > { %p609_p0 = pnand %p612_p13, %p782_p6 }
 0x1d2   : > { %p610_p1 = pneg %p609_p0 }
 0x1d4   : > { %698 = dma.done.wait (%p610_p1), %s476_s26, 2048  }
 0x1d5   : > { %700 = vsyncadd (%p610_p1), %s476_s26, 4294965248  ;;  %p13_p2 = scmp.ge.s32.totalorder %s765_s18, 4   ;;  %s897_s12 = smov %s707_s13 }
 0x1d6   : > { %s898_s13 = smov %s711_s14  ;;  %s899_s14 = smov %s776_s21 }
 0x1d7   : > { %s900_s15 = smov %s765_s18  ;;  %15 = sbr.rel (!%p13_p2) target bundleno = 3 (0x3), region = 68 }
 0x1dc   :  { %481 = vsyncpa [#allocation3], 1 }
 0x1dd   :  { %483 = vsyncpa [#allocation3 + $0x1], 1 }

</bundles_post_ra>
